<compile_context>
chip_gen: v5e
topology: v5e:2x2
jax: 0.10.0
libtpu: 0.0.40
codegen_flags: <defaults>
</compile_context>

<pallas_src>
import jax
import jax.numpy as jnp
from jax.experimental import pallas as pl
from jax.experimental.pallas import tpu as pltpu

SMOOTH = 1.0            # `smooth = 1` in the PyTorch module
LANES = 128
MAX_BLOCK_ROWS = 4096   # 4096 * 128 * 4 B = 2 MiB per f32 input block


def _dice_sum_kernel(x_ref, t_ref, acc_ref):
    """x_ref, t_ref: (R, 128) tile of one batch element (native dtype).
    acc_ref: (8, 128) f32 accumulator, resident across the reduction grid axis;
    accumulates partial sums of (inputs + targets) for this batch element."""
    j = pl.program_id(1)

    @pl.when(j == 0)
    def _():
        acc_ref[...] = jnp.zeros_like(acc_ref)

    x = x_ref[...].astype(jnp.float32)
    t = t_ref[...].astype(jnp.float32)
    s = x + t                                   # "intersection" = input + target (per spec)
    r = s.shape[0]
    # Fold (R, 128) -> (8, 128) with full-vreg VALU adds (R is a multiple of 8,
    # and groups of 8 rows align exactly with (8, 128) tile boundaries).
    acc_ref[...] += s.reshape(r // 8, 8, LANES).sum(axis=0)


def binary_dice_loss(inputs, targets):
    """Forward pass of BinaryDiceLoss for NCHW (or any per-batch) inputs/targets."""
    B = targets.shape[0]
    x = inputs.reshape(B, -1)       # keep native dtype; cast to f32 inside the kernel
    t = targets.reshape(B, -1)
    n = x.shape[1]

    # Rows of 128 lanes per batch element; block rows are a multiple of 8.
    rows = pl.cdiv(n, LANES)
    block_rows = min(MAX_BLOCK_ROWS, ((rows + 7) // 8) * 8)
    num_chunks = pl.cdiv(rows, block_rows)
    n_padded = num_chunks * block_rows * LANES

    if n_padded != n:
        # Zero padding is exact for a pure sum reduction; handles arbitrary C*H*W
        # without dropping to tiny tiles.
        x = jnp.pad(x, ((0, 0), (0, n_padded - n)))
        t = jnp.pad(t, ((0, 0), (0, n_padded - n)))

    x3 = x.reshape(B, num_chunks * block_rows, LANES)
    t3 = t.reshape(B, num_chunks * block_rows, LANES)

    # 2 buffers per pipelined input + double-buffered (8,128) output + margin.
    block_bytes = block_rows * LANES * (x3.dtype.itemsize + t3.dtype.itemsize)
    vmem_limit = int(2 * block_bytes + 2 * 8 * LANES * 4 + (4 << 20))

    sums = pl.pallas_call(
        _dice_sum_kernel,
        out_shape=jax.ShapeDtypeStruct((B, 8, LANES), jnp.float32),
        grid_spec=pltpu.PrefetchScalarGridSpec(
            num_scalar_prefetch=0,
            grid=(B, num_chunks),
            in_specs=[
                pl.BlockSpec((None, block_rows, LANES), lambda b, j: (b, j, 0)),
                pl.BlockSpec((None, block_rows, LANES), lambda b, j: (b, j, 0)),
            ],
            out_specs=pl.BlockSpec((None, 8, LANES), lambda b, j: (b, 0, 0)),
        ),
        compiler_params=pltpu.CompilerParams(
            dimension_semantics=("parallel", "arbitrary"),
            vmem_limit_bytes=vmem_limit,
        ),
    )(x3, t3)

    s = sums.sum(axis=(1, 2))                          # per-batch sum of (inputs + targets)
    dice_eff = (2.0 * s + SMOOTH) / (s + SMOOTH)       # denom = sum(x)+sum(t)+1 = s+1
    return 1.0 - dice_eff.sum() / B


def _reference(inputs, targets):
    """Pure-JAX reference mirroring the PyTorch module exactly."""
    B = targets.shape[0]
    x = inputs.reshape(B, -1).astype(jnp.float32)
    t = targets.reshape(B, -1).astype(jnp.float32)
    inter = (x + t).sum(axis=1)
    eff = (2.0 * inter + SMOOTH) / (x.sum(axis=1) + t.sum(axis=1) + SMOOTH)
    return 1.0 - eff.sum() / B


if __name__ == "__main__":
    key = jax.random.PRNGKey(0)
    k1, k2 = jax.random.split(key)

    B, C, H, W = 2, 4, 16, 16
    inputs = jax.nn.sigmoid(jax.random.normal(k1, (B, C, H, W), dtype=jnp.float32))
    targets = (jax.random.uniform(k2, (B, C, H, W)) > 0.5).astype(jnp.float32)

    out = binary_dice_loss(inputs, targets)
    out = jax.block_until_ready(out)

    ref = _reference(inputs, targets)
    assert jnp.allclose(out, ref, rtol=1e-5, atol=1e-5), (out, ref)

    print("KERNEL_OK")
</pallas_src>

<mosaic_0001>
module attributes {stable_mosaic.version = 11 : i64} {
  func.func @_dice_sum_kernel(%arg0: i32, %arg1: i32, %arg2: memref<1x8x128xf32, #tpu.memory_space<vmem>>, %arg3: memref<1x8x128xf32, #tpu.memory_space<vmem>>, %arg4: memref<1x8x128xf32, #tpu.memory_space<vmem>>) attributes {dimension_semantics = [#tpu.dimension_semantics<parallel>, #tpu.dimension_semantics<arbitrary>], iteration_bounds = array<i64: 2, 1>, scalar_prefetch = 0 : i64, scratch_operands = 0 : i64, tpu.core_type = #tpu.core_type<tc>, window_params = [{transform_indices = @transform_0, window_bounds = array<i64: 1, 8, 128>}, {transform_indices = @transform_1, window_bounds = array<i64: 1, 8, 128>}, {transform_indices = @transform_2, window_bounds = array<i64: 1, 8, 128>}]} {
    %c0_i32 = arith.constant 0 : i32
    %0 = arith.cmpi eq, %arg1, %c0_i32 : i32
    %1 = arith.extui %0 : i1 to i32
    %c0_i32_0 = arith.constant 0 : i32
    %2 = arith.cmpi ne, %1, %c0_i32_0 : i32
    scf.if %2 {
      %cst_12 = arith.constant 0.000000e+00 : f32
      %16 = vector.broadcast %cst_12 : f32 to vector<8x128xf32>
      %c0_13 = arith.constant 0 : index
      %c0_14 = arith.constant 0 : index
      %c0_15 = arith.constant 0 : index
      %17 = vector.load %arg4[%c0_13, %c0_14, %c0_15] : memref<1x8x128xf32, #tpu.memory_space<vmem>>, vector<1x8x128xf32>
      %18 = vector.shape_cast %17 : vector<1x8x128xf32> to vector<8x128xf32>
      %19 = vector.shape_cast %16 : vector<8x128xf32> to vector<1x8x128xf32>
      tpu.vector_store %arg4[%c0_13, %c0_14, %c0_15], %19 {strides = array<i32>} : memref<1x8x128xf32, #tpu.memory_space<vmem>>, vector<1x8x128xf32>,
    } else {
    }
    %c0 = arith.constant 0 : index
    %c0_1 = arith.constant 0 : index
    %c0_2 = arith.constant 0 : index
    %3 = vector.load %arg2[%c0, %c0_1, %c0_2] : memref<1x8x128xf32, #tpu.memory_space<vmem>>, vector<1x8x128xf32>
    %4 = vector.shape_cast %3 : vector<1x8x128xf32> to vector<8x128xf32>
    %c0_3 = arith.constant 0 : index
    %c0_4 = arith.constant 0 : index
    %c0_5 = arith.constant 0 : index
    %5 = vector.load %arg3[%c0_3, %c0_4, %c0_5] : memref<1x8x128xf32, #tpu.memory_space<vmem>>, vector<1x8x128xf32>
    %6 = vector.shape_cast %5 : vector<1x8x128xf32> to vector<8x128xf32>
    %7 = arith.addf %4, %6 : vector<8x128xf32>
    %c0_6 = arith.constant 0 : index
    %c0_7 = arith.constant 0 : index
    %c0_8 = arith.constant 0 : index
    %8 = vector.load %arg4[%c0_6, %c0_7, %c0_8] : memref<1x8x128xf32, #tpu.memory_space<vmem>>, vector<1x8x128xf32>
    %9 = vector.shape_cast %8 : vector<1x8x128xf32> to vector<8x128xf32>
    %10 = vector.shape_cast %7 : vector<8x128xf32> to vector<1x8x128xf32>
    %cst = arith.constant dense<0.000000e+00> : vector<8x128xf32>
    %11 = vector.multi_reduction <add>, %10, %cst [0] : vector<1x8x128xf32> to vector<8x128xf32>
    %12 = arith.addf %9, %11 : vector<8x128xf32>
    %c0_9 = arith.constant 0 : index
    %c0_10 = arith.constant 0 : index
    %c0_11 = arith.constant 0 : index
    %13 = vector.load %arg4[%c0_9, %c0_10, %c0_11] : memref<1x8x128xf32, #tpu.memory_space<vmem>>, vector<1x8x128xf32>
    %14 = vector.shape_cast %13 : vector<1x8x128xf32> to vector<8x128xf32>
    %15 = vector.shape_cast %12 : vector<8x128xf32> to vector<1x8x128xf32>
    tpu.vector_store %arg4[%c0_9, %c0_10, %c0_11], %15 {strides = array<i32>} : memref<1x8x128xf32, #tpu.memory_space<vmem>>, vector<1x8x128xf32>,
    return
  }
  func.func @transform_0(%arg0: i32, %arg1: i32) -> (i32, i32, i32) {
    %c0_i32 = arith.constant 0 : i32
    %c0_i32_0 = arith.constant 0 : i32
    return %arg0, %arg1, %c0_i32 : i32, i32, i32
  }
  func.func @transform_1(%arg0: i32, %arg1: i32) -> (i32, i32, i32) {
    %c0_i32 = arith.constant 0 : i32
    %c0_i32_0 = arith.constant 0 : i32
    return %arg0, %arg1, %c0_i32 : i32, i32, i32
  }
  func.func @transform_2(%arg0: i32, %arg1: i32) -> (i32, i32, i32) {
    %c0_i32 = arith.constant 0 : i32
    %c0_i32_0 = arith.constant 0 : i32
    %c0_i32_1 = arith.constant 0 : i32
    return %arg0, %c0_i32, %c0_i32_0 : i32, i32, i32
  }
}

</mosaic_0001>

<bundles_post_ra>
// kernel: tpu_custom_call.1
= control target key start
LH: loop header
LB: loop body
LE: loop exit
PB: predicated region body
PF: predicated region fallthrough
CT: control target
= control target key end

     0   :  { %7 = vsyncpa [#allocation3], 0  ;;  %s724_s0 = inlined_call_operand.hbm [shape: f32[2,8,128], index: 0, kind: input, shape index: {}]   ;;  %s725_s1 = inlined_call_operand.hbm [shape: f32[2,8,128], index: 1, kind: input, shape index: {}]   ;;  %s726_s2 = inlined_call_operand.hbm [shape: f32[2,8,128], index: 2, kind: output, shape index: {}]  }
   0x1   :  { %9 = vsyncpa [#allocation3 + $0x1], 0 }
   0x2   :  { %10 = vsyncpa [#allocation6], 0 }
   0x3   :  { %12 = vsyncpa [#allocation6 + $0x1], 0 }
   0x4   :  { %13 = vsyncpa [#allocation4], 0 }
   0x5   :  { %15 = vsyncpa [#allocation4 + $0x1], 0  ;;  %s596_s9 = smov 0   ;;  %s598_s10 = smov 0  }
   0x6   :  { %s600_s11 = smov 0   ;;  %s602_s12 = smov 0  }
   0x7   :  { %s604_s13 = smov 0   ;;  %s606_s14 = smov 0  }
   0x8 LB: > { %s349_s15 = sadd.s32 4294967295, %s579_s14   ;;  %s350_s16 = sadd.s32 4294967294, %s579_s14   ;;  %s579_s14 = sphi %s606_s14, %s21_s14   ;;  %s575_s13 = sphi %s604_s13, %s735_s13   ;;  %s571_s12 = sphi %s602_s12, %s734_s12   ;;  %s567_s11 = sphi %s600_s11, %s733_s11   ;;  %s563_s10 = sphi %s598_s10, %s732_s10   ;;  %s559_s9 = sphi %s596_s9, %s731_s9  }
   0x9   : > { %s33_s17 = sadd.s32 1, %s575_s13  ;;  %s42_s18 = sadd.s32 1, %s567_s11 }
   0xa   : > { %p35_p0 = scmp.ge.s32.totalorder %s33_s17, 2  ;;  %p49_p1 = scmp.ne.s32.totalorder %s567_s11, %s563_s10 }
   0xb   : > { %p50_p2 = scmp.eq.s32.totalorder %s579_s14, 0  ;;  %p55_p3 = scmp.ne.s32.totalorder %s563_s10, %s559_s9 }
   0xc   : > { %s737_s17 = smov (%p35_p0, %s33_s17), 0  ;;  %p56_p5 = scmp.eq.s32.totalorder %s349_s15, 0 }
   0xd   : > { %p637_p4 = por %p50_p2, %p49_p1  ;;  %s37_s20 = ssub.s32 %s575_s13, %s737_s17 }
   0xe   : > { %p107_p6 = scmp.eq.s32.totalorder %s349_s15, 1  ;;  %p40_p7 = scmp.eq.s32.totalorder %s37_s20, 0 }
   0xf   : > { %p643_p8 = por %p56_p5, %p55_p3  ;;  %p113_p10 = scmp.eq.s32.totalorder %s350_s16, 1 }
  0x10   : > { %p647_p9 = por %p107_p6, %p49_p1  ;;  %p352_p12 = scmp.ge.s32.totalorder %s579_s14, 2 }
  0x11   : > { %s652_s23 = scalar_select %p40_p7, %s567_s11, %s42_s18  }
  0x12   : > { %p654_p11 = por %p113_p10, %p55_p3  ;;  %p382_p13 = scmp.lt.s32.totalorder %s579_s14, 2 }
  0x13   : > { %s133_s25 = sand.u32 1, %s567_s11   ;;  %s354_s27 = sshll.u32 %s575_s13, 3 }
  0x14   : > { %s353_s26 = sshll.u32 %s133_s25, 3  ;;  %s142_s30 = scalar_lea.hbm %s724_s0, %s354_s27 }
  0x15   : > { %s137_s3 = scalar_lea.vmem [#allocation2], %s353_s26  ;;  %s144_s5 = sshll.u32 %s142_s30, 4  ;;  %s145_s5 = int_to_ptr.hbm [resolvable:$true] %s144_s5 }
  0x16   : > { %s146_s4 = sshll.u32 %s137_s3, 4  ;;  %p372_p0 = pnand %p382_p13, %p637_p4  ;;  %s147_s4 = int_to_ptr.vmem [resolvable:$true] %s146_s4 }
  0x17   : > { %p357_p1 = scmp.ge.s32.totalorder %s579_s14, 1  ;;  %p171_p2 = scmp.lt.s32.totalorder %s579_s14, 3 }
  0x18   : > { %s134_s6 = scalar_lea.sflag [#allocation3], %s133_s25  ;;  %s162_s15 = scalar_lea.hbm %s725_s1, %s354_s27 }
  0x19   : > { %374 = dma.hbm_to_vmem [thread:$0]  (!%p372_p0), %s145_s5, 128, %s147_s4, %s134_s6  }
  0x1a   : > { %p172_p3 = pnand %p357_p1, %p171_p2  ;;  %s157_s16 = scalar_lea.vmem [#allocation5], %s353_s26 }
  0x1b   : > { %s166_s18 = sshll.u32 %s157_s16, 4  ;;  %s164_s20 = sshll.u32 %s162_s15, 4  ;;  %s167_s18 = int_to_ptr.vmem [resolvable:$true] %s166_s18  ;;  %s165_s20 = int_to_ptr.hbm [resolvable:$true] %s164_s20 }
  0x1c   : > { %s154_s28 = scalar_lea.sflag [#allocation6], %s133_s25  ;;  %175 = sbr.rel (%p172_p3) target bundleno = 51 (0x33), region = 28 }
  0x1d   : > { %377 = dma.hbm_to_vmem [thread:$0]  (!%p372_p0), %s165_s20, 128, %s167_s18, %s154_s28  }
  0x1e   : > { %s673_s19 = sand.u32 (!%p172_p3), 1, %s563_s10  }
  0x1f   : > { %s358_s29 = sshll.u32 (!%p172_p3), %s673_s19, 3  ;;  %s178_s30 = scalar_lea.sflag (!%p172_p3), [#allocation3], %s673_s19 }
  0x20   : > { %s181_s3 = scalar_lea.vmem (!%p172_p3), [#allocation2], %s358_s29 }
  0x21   : > { %546 = dma.done.wait (%p643_p8), %s178_s30, 128  }
  0x22   : > { %548 = vsyncadd (%p643_p8), %s178_s30, 4294967168  ;;  %s188_s26 = scalar_lea.sflag [#allocation6], %s673_s19  ;;  %s191_s25 = scalar_lea.vmem [#allocation5], %s358_s29 }
  0x23   : > { %550 = dma.done.wait (%p643_p8), %s188_s26, 128  }
  0x24   : > { %552 = vsyncadd (%p643_p8), %s188_s26, 4294967168  ;;  %s362_s27 = sshll.u32 %s571_s12, 3  ;;  %v223_v0 = vld [vmem:[%s181_s3] sm:$0xff]  ;;  %v224_v1 = vld [vmem:[%s191_s25] sm:$0xff]  ;;  %s217_s7 = scalar_lea.vmem [#allocation7], %s358_s29 }
  0x25   : > { %s241_s6 = scalar_lea.hbm %s726_s2, %s362_s27  ;;  %s243_s8 = sshll.u32 %s217_s7, 4  ;;  %v225_v2 = vadd.f32 %v224_v1, %v223_v0  ;;  %s244_s8 = int_to_ptr.vmem [resolvable:$true] %s243_s8 }
  0x26   : > { %s245_s15 = sshll.u32 %s241_s6, 4  ;;  %s231_s16 = scalar_lea.sflag [#allocation4], %s673_s19  ;;  %s246_s15 = int_to_ptr.hbm [resolvable:$true] %s245_s15 }
  0x27   : > { %229 = vst [vmem:[%s217_s7] sm:$0xff] %v225_v2  ;;  %s507_s21 = sshra.s32 %s246_s15, 4  ;;  %s513_s28 = scalar_lea.hbm %s726_s2, 16  ;;  %s508_s21 = int_to_ptr.hbm [resolvable:$true] %s507_s21 }
  0x28   : > { %s509_s18 = scalar_lea.hbm %s508_s21, 8  ;;  %p514_p7 = scmp.lt.s32.totalorder %s508_s21, %s726_s2 }
  0x29   : > { %p510_p4 = scmp.ne.s32.totalorder %s508_s21, %s509_s18  ;;  %p515_p8 = scmp.lt.s32.totalorder %s513_s28, %s509_s18 }
  0x2b   : > { %p511_p5 = pnand %p510_p4, %p647_p9  ;;  %p516_p10 = por %p515_p8, %p514_p7 }
  0x2d   : > { %p512_p6 = pneg %p511_p5 }
  0x2f   : > { %p517_p13 = pnand %p516_p10, %p512_p6 }
  0x31   : > { %520 = shalt.err (!%p517_p13)
}
  0x32   : > { %369 = dma.vmem_to_hbm [thread:$0]  (%p647_p9), %s244_s8, 128, %s246_s15, %s231_s16  }
  0x33 PF: > { %s257_s19 = sand.u32 1, %s559_s9   ;;  %p379_p0 = pnand %p352_p12, %p654_p11 }
  0x34   : > { %s258_s3 = scalar_lea.sflag [#allocation4], %s257_s19 }
  0x35   : > { %p380_p1 = pneg %p379_p0 }
  0x37   : > { %554 = dma.done.wait (%p380_p1), %s258_s3, 128  }
  0x38   : > { %556 = vsyncadd (%p380_p1), %s258_s3, 4294967168  ;;  %s21_s14 = sadd.s32 1, %s579_s14   ;;  %s731_s9 = smov %s563_s10 }
  0x39   : > { %p18_p2 = scmp.ge.s32.totalorder %s21_s14, 4   ;;  %s732_s10 = smov %s567_s11 }
  0x3a   : > { %s733_s11 = smov %s652_s23  ;;  %s734_s12 = smov %s575_s13 }
  0x3b   : > { %s735_s13 = smov %s737_s17  ;;  %20 = sbr.rel (!%p18_p2) target bundleno = 8 (0x8), region = 90 }
  0x40   :  { %264 = vsyncpa [#allocation3], 1 }
  0x41   :  { %266 = vsyncpa [#allocation3 + $0x1], 1 }
  0x42   :  { %267 = vsyncpa [#allocation6], 1 }
  0x43   :  { %269 = vsyncpa [#allocation6 + $0x1], 1 }
  0x44   :  { %270 = vsyncpa [#allocation4], 1 }
  0x45   :  { %272 = vsyncpa [#allocation4 + $0x1], 1 }

</bundles_post_ra>
